<compile_context>
chip_gen: v5e
topology: v5e:2x2
jax: 0.10.0
libtpu: 0.0.40
codegen_flags: <defaults>
</compile_context>

<pallas_src>
import functools

import jax
import jax.numpy as jnp
from jax.experimental import pallas as pl
from jax.experimental.pallas import tpu as pltpu


def _fc_argmax_kernel(enc_ref, w_ref, b_ref, logits_ref, yhat_ref, *, t_real):
    # enc_ref:    (TM, H)   float32   streamed activation tile
    # w_ref:      (H,  Tp)  bfloat16  fc weight (grid-invariant, resident)
    # b_ref:      (1,  Tp)  float32   fc bias, padded lanes = finfo(f32).min
    # logits_ref: (TM, T)   float32   unpadded logits writeback
    # yhat_ref:   (TM, 1)   int32
    enc = enc_ref[...].astype(jnp.bfloat16)            # on-chip cast (VPU)
    logits = jnp.dot(enc, w_ref[...], preferred_element_type=jnp.float32)
    logits = logits + b_ref[...]                       # f32 epilogue (v5e-friendly)
    logits_ref[...] = logits[:, :t_real]               # only real tag lanes hit HBM
    # argmax over the (lane) tag axis; padded lanes carry finfo.min bias so they
    # never win (ties break to the first / real index anyway).
    yhat_ref[...] = jnp.argmax(logits, axis=-1)[:, None].astype(jnp.int32)


def fc_argmax(enc2d, W, b, *, tm=1024):
    """enc2d: [M, H] float32, W: [H, T], b: [T] -> (logits [M, T] f32, yhat [M] i32)."""
    M, H = enc2d.shape
    T = W.shape[1]

    # Lane-dense tag width for the MXU / argmax (in-register only; writeback is T).
    Tp = 128 * pl.cdiv(T, 128)

    # ---- row-tile selection --------------------------------------------------
    tm = max(16, 16 * (int(tm) // 16))            # multiple of 16
    tm = min(tm, 16 * pl.cdiv(M, 16))             # never larger than needed
    if M >= 32:
        # Prefer >= 2 grid steps so v7x's two TensorCores both get work.
        tm = min(tm, 16 * pl.cdiv(pl.cdiv(M, 2), 16))
    grid = (pl.cdiv(M, tm),)                      # ragged last block handled by Pallas

    # ---- resident operands ---------------------------------------------------
    enc_p = enc2d.astype(jnp.float32)             # no-op if already f32
    w_p = W.astype(jnp.bfloat16)                  # tiny + resident: cast once
    b_p = b.astype(jnp.float32)
    if Tp != T:
        w_p = jnp.pad(w_p, ((0, 0), (0, Tp - T)))
        b_p = jnp.pad(b_p, (0, Tp - T),
                      constant_values=jnp.finfo(jnp.float32).min)
    b_p = b_p.reshape(1, Tp)

    cost = pl.CostEstimate(
        flops=2 * M * H * Tp,
        bytes_accessed=M * H * 4 + M * T * 4 + M * 4 + H * Tp * 2 + Tp * 4,
        transcendentals=0,
    )

    logits, yhat = pl.pallas_call(
        functools.partial(_fc_argmax_kernel, t_real=T),
        out_shape=(
            jax.ShapeDtypeStruct((M, T), jnp.float32),
            jax.ShapeDtypeStruct((M, 1), jnp.int32),
        ),
        grid_spec=pltpu.PrefetchScalarGridSpec(
            num_scalar_prefetch=0,
            grid=grid,
            in_specs=[
                pl.BlockSpec((tm, H), lambda i: (i, 0)),   # enc tile (streamed f32)
                pl.BlockSpec((H, Tp), lambda i: (0, 0)),   # fc weight (resident)
                pl.BlockSpec((1, Tp), lambda i: (0, 0)),   # fc bias   (resident)
            ],
            out_specs=[
                pl.BlockSpec((tm, T), lambda i: (i, 0)),   # unpadded logits
                pl.BlockSpec((tm, 1), lambda i: (i, 0)),   # argmax column
            ],
        ),
        compiler_params=pltpu.CompilerParams(
            dimension_semantics=("parallel",),             # megacore on v7x
            vmem_limit_bytes=48 * 1024 * 1024,             # safe on v5e/v6e/v7x
        ),
        cost_estimate=cost,
    )(enc_p, w_p, b_p)

    return logits, yhat[:, 0]


def net_forward(x, y, emb_table, fc_w, fc_b):
    """Mirrors Net.forward(x, y) -> (logits, y, y_hat)."""
    B, S = x.shape
    T = fc_w.shape[1]

    # TODO(synk): frozen BERT encoder stand-in (deterministic embedding lookup).
    enc = emb_table[x]                      # [B, S, H] float32 (glue: gather)

    enc2d = enc.reshape(B * S, emb_table.shape[1])
    logits2d, yhat1d = fc_argmax(enc2d, fc_w, fc_b)

    logits = logits2d.reshape(B, S, T)
    y_hat = yhat1d.reshape(B, S)
    return logits, y, y_hat


if __name__ == "__main__":
    # Small shapes consistent with the module's forward:
    #   x: token ids [B, S], y: tag ids [B, S], hidden_size=32, tag_size=16
    B, S, H, T = 2, 8, 32, 16
    VOCAB = 64

    key = jax.random.PRNGKey(0)
    k_x, k_y, k_emb, k_w, k_b = jax.random.split(key, 5)

    x = jax.random.randint(k_x, (B, S), 0, VOCAB, dtype=jnp.int32)
    y = jax.random.randint(k_y, (B, S), 0, T, dtype=jnp.int32)

    emb_table = jax.random.normal(k_emb, (VOCAB, H), dtype=jnp.float32) * 0.02
    fc_w = jax.random.normal(k_w, (H, T), dtype=jnp.float32) * (1.0 / (H ** 0.5))
    fc_b = jax.random.normal(k_b, (T,), dtype=jnp.float32) * 0.01

    logits, y_out, y_hat = jax.jit(net_forward)(x, y, emb_table, fc_w, fc_b)
    jax.block_until_ready((logits, y_out, y_hat))

    # Reference 1: bf16-matched numerics (what the kernel computes) -> tight tol.
    enc_bf = emb_table[x].reshape(B * S, H).astype(jnp.bfloat16)
    logits_bf16_ref = (jnp.dot(enc_bf, fc_w.astype(jnp.bfloat16),
                               preferred_element_type=jnp.float32)
                       + fc_b).reshape(B, S, T)
    yhat_ref = jnp.argmax(logits_bf16_ref, axis=-1).astype(jnp.int32)

    # Reference 2: full-f32 nn.Linear numerics -> looser tol.
    logits_f32_ref = (jnp.dot(emb_table[x].reshape(B * S, H), fc_w,
                              preferred_element_type=jnp.float32)
                      + fc_b).reshape(B, S, T)

    assert logits.shape == (B, S, T)
    assert y_hat.shape == (B, S)
    assert jnp.allclose(logits, logits_bf16_ref, atol=1e-3, rtol=1e-3), \
        "logits mismatch vs bf16-matched reference"
    assert jnp.allclose(logits, logits_f32_ref, atol=2e-2, rtol=2e-2), \
        "logits mismatch vs f32 reference"
    # Self-consistency: kernel argmax matches argmax of its own (unpadded) logits,
    # which also proves no padded tag lane ever won.
    assert jnp.array_equal(
        y_hat, jnp.argmax(logits, axis=-1).astype(jnp.int32)), "argmax inconsistent"
    assert jnp.array_equal(y_hat, yhat_ref), "argmax mismatch vs reference"
    assert jnp.array_equal(y_out, y), "y passthrough mismatch"

    print("KERNEL_OK")
</pallas_src>

<mosaic_0001>
module attributes {stable_mosaic.version = 11 : i64} {
  func.func @_fc_argmax_kernel(%arg0: i32, %arg1: memref<16x32xf32, #tpu.memory_space<vmem>>, %arg2: memref<32x128xbf16, #tpu.memory_space<vmem>>, %arg3: memref<1x128xf32, #tpu.memory_space<vmem>>, %arg4: memref<16x16xf32, #tpu.memory_space<vmem>>, %arg5: memref<16x1xi32, #tpu.memory_space<vmem>>) attributes {dimension_semantics = [#tpu.dimension_semantics<parallel>], iteration_bounds = array<i64: 1>, scalar_prefetch = 0 : i64, scratch_operands = 0 : i64, tpu.core_type = #tpu.core_type<tc>, window_params = [{transform_indices = @transform_0, window_bounds = array<i64: 16, 32>}, {pipeline_mode = #tpu.pipeline_mode<synchronous>, transform_indices = @transform_1, window_bounds = array<i64: 32, 128>}, {pipeline_mode = #tpu.pipeline_mode<synchronous>, transform_indices = @transform_2, window_bounds = array<i64: 1, 128>}, {transform_indices = @transform_3, window_bounds = array<i64: 16, 16>}, {transform_indices = @transform_4, window_bounds = array<i64: 16, 1>}]} {
    %c0 = arith.constant 0 : index
    %c0_0 = arith.constant 0 : index
    %0 = vector.load %arg1[%c0, %c0_0] : memref<16x32xf32, #tpu.memory_space<vmem>>, vector<16x32xf32>
    %1 = arith.truncf %0 : vector<16x32xf32> to vector<16x32xbf16>
    %c0_1 = arith.constant 0 : index
    %c0_2 = arith.constant 0 : index
    %2 = vector.load %arg2[%c0_1, %c0_2] : memref<32x128xbf16, #tpu.memory_space<vmem>>, vector<32x128xbf16>
    %cst = arith.constant dense<0.000000e+00> : vector<16x128xf32>
    %3 = tpu.matmul %1, %2, %cst {dimension_numbers = #tpu.dot_dimension_numbers<[1], [0], [0], [1], [0, 0, 1, 1], [], []>} : vector<16x32xbf16>, vector<32x128xbf16>, vector<16x128xf32> -> vector<16x128xf32>
    %c0_3 = arith.constant 0 : index
    %c0_4 = arith.constant 0 : index
    %4 = vector.load %arg3[%c0_3, %c0_4] : memref<1x128xf32, #tpu.memory_space<vmem>>, vector<1x128xf32>
    %5 = vector.broadcast %4 : vector<1x128xf32> to vector<16x128xf32>
    %6 = arith.addf %3, %5 : vector<16x128xf32>
    %7 = vector.extract_strided_slice %6 {offsets = [0, 0], sizes = [16, 16], strides = [1, 1]} : vector<16x128xf32> to vector<16x16xf32>
    %c0_5 = arith.constant 0 : index
    %c0_6 = arith.constant 0 : index
    %8 = vector.load %arg4[%c0_5, %c0_6] : memref<16x16xf32, #tpu.memory_space<vmem>>, vector<16x16xf32>
    tpu.vector_store %arg4[%c0_5, %c0_6], %7 {strides = array<i32>} : memref<16x16xf32, #tpu.memory_space<vmem>>, vector<16x16xf32>,
    %9 = tpu.reduce_index %6 {axis = 1 : i32, kind = #tpu.reduction_kind<arg_max>} : vector<16x128xf32> -> vector<16xi32>
    %10 = vector.shape_cast %9 : vector<16xi32> to vector<16x1xi32>
    %c0_7 = arith.constant 0 : index
    %c0_8 = arith.constant 0 : index
    %11 = vector.load %arg5[%c0_7, %c0_8] : memref<16x1xi32, #tpu.memory_space<vmem>>, vector<16x1xi32>
    tpu.vector_store %arg5[%c0_7, %c0_8], %10 {strides = array<i32>} : memref<16x1xi32, #tpu.memory_space<vmem>>, vector<16x1xi32>,
    return
  }
  func.func @transform_0(%arg0: i32) -> (i32, i32) {
    %c0_i32 = arith.constant 0 : i32
    %c0_i32_0 = arith.constant 0 : i32
    return %arg0, %c0_i32 : i32, i32
  }
  func.func @transform_1(%arg0: i32) -> (i32, i32) {
    %c0_i32 = arith.constant 0 : i32
    %c0_i32_0 = arith.constant 0 : i32
    %c0_i32_1 = arith.constant 0 : i32
    return %c0_i32, %c0_i32_0 : i32, i32
  }
  func.func @transform_2(%arg0: i32) -> (i32, i32) {
    %c0_i32 = arith.constant 0 : i32
    %c0_i32_0 = arith.constant 0 : i32
    %c0_i32_1 = arith.constant 0 : i32
    return %c0_i32, %c0_i32_0 : i32, i32
  }
  func.func @transform_3(%arg0: i32) -> (i32, i32) {
    %c0_i32 = arith.constant 0 : i32
    %c0_i32_0 = arith.constant 0 : i32
    return %arg0, %c0_i32 : i32, i32
  }
  func.func @transform_4(%arg0: i32) -> (i32, i32) {
    %c0_i32 = arith.constant 0 : i32
    %c0_i32_0 = arith.constant 0 : i32
    return %arg0, %c0_i32 : i32, i32
  }
}

</mosaic_0001>

<bundles_post_ra>
// kernel: squeeze.1
= control target key start
LH: loop header
LB: loop body
LE: loop exit
PB: predicated region body
PF: predicated region fallthrough
CT: control target
= control target key end

     0   :  { %s80_s0 = inlined_call_operand.vmem [shape: s32[16], index: 0, kind: input, shape index: {}]   ;;  %s81_s1 = inlined_call_operand.hbm [shape: s32[2,8], index: 1, kind: output, shape index: {}]  }
   0x1   :  { %v5_v0 = vld [vmem:[%s80_s0] sm:$0x1] }
   0x2   :  { %2 = vsyncpa [#allocation1], 0  ;;  %6 = vst [vmem:[#allocation3] sm:$0x1] %v5_v0  ;;  %vm8_vm0 = vcmask 64512   ;;  %s62_s0 = smov 120  }
   0x3   :  { %s63_s8 = smov [#allocation0]   ;;  %s27_s1 = sshll.u32 %s81_s1, 4  ;;  %s28_s1 = int_to_ptr.hbm [resolvable:$true] %s27_s1 }
   0x4   :  { %s25_s9 = sshll.u32 %s63_s8, 4  ;;  %s26_s9 = int_to_ptr.vmem [resolvable:$true] %s25_s9 }
   0x9   :  { %v10_v1 = vld [vmem:[#allocation3] sm:$0x1]  }
   0xa   :  { %v7_v2 = vld [vmem:[#allocation3] sm:$0x1]   ;;  %11 = vrot.lane.b32.xlu0 %v10_v1, %s62_s0 }
   0xb   :  { %9 = vst.msk [vmem:[#allocation2] sm:$0x1] %vm8_vm0, %v7_v2  }
  0x7c   :  { %v12_v3 = vpop.permute.xlu0 %11  }
  0x7d   :  { %15 = vst.msk [vmem:[#allocation2 + $0x1] sm:$0x1] %vm8_vm0, %v12_v3  }
  0x84   :  { %v18_v4 = vld [vmem:[#allocation2] sm:$0x3] }
  0x85   :  { %21 = vst [vmem:[#allocation0] sm:$0x3] %v18_v4 }
  0x86   :  { %30 = dma.vmem_to_hbm [thread:$0]  %s26_s9, 32, %s28_s1, [#allocation1]  }
  0x87   :  { %60 = dma.done.wait [#allocation1], 32  }
  0x88   :  { %61 = vsyncadd [#allocation1], 4294967264 }
  0x89   :  { %33 = vsyncpa [#allocation1], 1 }

// kernel: net_forward.1
= control target key start
LH: loop header
LB: loop body
LE: loop exit
PB: predicated region body
PF: predicated region fallthrough
CT: control target
= control target key end

     0   :  { %s184_s0 = inlined_call_operand.vmem [shape: f32[16,32], index: 0, kind: input, shape index: {}]   ;;  %s185_s1 = inlined_call_operand.vmem [shape: bf16[32,128], index: 1, kind: input, shape index: {}]   ;;  %s186_s2 = inlined_call_operand.vmem [shape: f32[1,128], index: 2, kind: input, shape index: {}]   ;;  %s187_s3 = inlined_call_operand.hbm [shape: f32[16,16], index: 3, kind: output, shape index: {0}]   ;;  %s188_s4 = inlined_call_operand.vmem [shape: s32[16,1], index: 4, kind: output, shape index: {1}]  }
   0x1   :  { %v101_v0 = vld [vmem:[%s185_s1 + $0x8] sm:$0xff]  ;;  %v100_v1 = vld [vmem:[%s185_s1] sm:$0xff] }
   0x2   :  { %51 = vmatpush.bf16.msra.mxu0 %v101_v0  ;;  %v18_v2 = vld [vmem:[%s184_s0] sm:$0xff]  ;;  %v19_v3 = vld [vmem:[%s184_s0 + $0x8] sm:$0xff] }
   0x3   :  { %10 = vsyncpa [#allocation3], 0  ;;  %v20_v4 = vpack.c.bf16 %v19_v3, %v18_v2  ;;  %vm41_vm0 = vcmask 261120   ;;  %v105_v5 = vld [vmem:[%s186_s2] ss:$0 sm:$0xff]  ;;  %vm59_vm1 = vcmask 130048  }
   0x4   :  { %s132_s1 = smov [#allocation2]   ;;  %s75_s0 = sshll.u32 %s187_s3, 4  ;;  %vm66_vm2 = vcmask 7168   ;;  %s76_s0 = int_to_ptr.hbm [resolvable:$true] %s75_s0 }
   0x5   :  { %s73_s25 = sshll.u32 %s132_s1, 4  ;;  %s133_s28 = smov 128   ;;  %s74_s25 = int_to_ptr.vmem [resolvable:$true] %s73_s25 }
   0x6   :  { %52 = vmatpush.bf16.msra.mxu0 %v100_v1  ;;  %s134_s29 = smov 8  }
   0x9   :  { %99 = vmatmul.msk.bf16.vlgmr.msra.gmra.mxu0 %vm41_vm0, %v20_v4 }
  0x86   :  { %v54_v6 = vpop.f32.mrf.mxu0 }
  0x87   :  { %v55_v7 = vadd.f32 %v105_v5, %v54_v6 }
  0x89   :  { %60 = vst.msk [vmem:[#allocation2] sm:$0xff] %vm59_vm1, %v55_v7  ;;  %62 = vmax.index.xlane.f32.xlu0 %v55_v7 }
  0x8e   :  { %v56_v8 = vpop.f32.mrf.mxu0 }
  0x8f   :  { %v57_v9 = vadd.f32 %v105_v5, %v56_v8 }
  0x91   :  { %61 = vst.msk [vmem:[#allocation2 + $0x8] sm:$0xff] %vm59_vm1, %v57_v9  ;;  %64 = vmax.index.xlane.f32.xlu0 %v57_v9 }
  0x92   :  { %81 = dma.vmem_to_hbm [thread:$0]  %s74_s25, 256, %s76_s0, [#allocation3], %s133_s28, %s133_s28, %s134_s29  }
  0xfc   :  { %v63_v10 = vpop.xlane.xlu0 %62 }
  0xfd   :  { %67 = vst.msk [vmem:[%s188_s4] sm:$0xff] %vm66_vm2, %v63_v10 }
 0x104   :  { %v65_v11 = vpop.xlane.xlu0 %64 }
 0x105   :  { %68 = vst.msk [vmem:[%s188_s4 + $0x8] sm:$0xff] %vm66_vm2, %v65_v11 }
 0x106   :  { %130 = dma.done.wait [#allocation3], 256  }
 0x107   :  { %131 = vsyncadd [#allocation3], 4294967040 }
 0x108   :  { %90 = vsyncpa [#allocation3], 1 }

</bundles_post_ra>
